<compile_context>
chip_gen: v7x
topology: tpu7x:2x2x1
jax: 0.10.0
libtpu: 0.0.40
codegen_flags: <defaults>
</compile_context>

<pallas_src>
import jax
import jax.numpy as jnp
from jax.experimental import pallas as pl
from jax.experimental.pallas import tpu as pltpu

LANE = 128
SUBLANE_BF16 = 16  # bf16 packs 2 rows/sublane -> 16-row quantum for the bf16 output


def _round_up(n, m):
    return ((n + m - 1) // m) * m


def _choose_tiling(B, tile_b):
    """Pick (tile_b, padded_b): minimal batch padding, >=2 grid steps when B>16."""
    if B <= SUBLANE_BF16:
        tb = _round_up(max(B, 1), SUBLANE_BF16)
        return tb, tb
    # At least 2 steps so the v7x megacore batch split is real; cap tile at tile_b.
    n_steps = max(-(-B // tile_b), 2)
    tb = _round_up(-(-B // n_steps), SUBLANE_BF16)
    return tb, tb * n_steps


def nn_stack_kernel(x_ref, w1_ref, b1_ref, w2_ref, b2_ref, w3_ref, b3_ref, o_ref):
    """Fused MLP stack: relu(relu(x@W1+b1)@W2+b2)@W3+b3 for one batch tile.

    x arrives f32 at its real (unpadded) feature width and is cast to the
    compute dtype in-kernel; MXU accumulates f32; bias add / ReLU run in f32;
    the lane-dense (tb, 128) output tile is stored bf16.
    """
    cd = w1_ref.dtype
    x = x_ref[...].astype(cd)                                 # in-kernel f32 -> bf16 cast

    # block 0: Linear + ReLU  (MXU matmul, f32 accumulate; VPU bias+relu in f32)
    h = jnp.dot(x, w1_ref[...], preferred_element_type=jnp.float32)
    h = jnp.maximum(h + b1_ref[...], 0.0)

    # block 1: Linear + ReLU
    h = jnp.dot(h.astype(cd), w2_ref[...], preferred_element_type=jnp.float32)
    h = jnp.maximum(h + b2_ref[...], 0.0)

    # block 2 (head): Linear, no activation
    h = jnp.dot(h.astype(cd), w3_ref[...], preferred_element_type=jnp.float32)
    h = h + b3_ref[...]

    o_ref[...] = h.astype(o_ref.dtype)                        # lane-dense bf16 store


def nn_stack_forward(x, padded, out_dim, *, tile_b=2048, compute_dtype=jnp.bfloat16):
    """Run the fused NNStack kernel.

    x:       (B, input_dim) f32 — used at its real feature width (no lane padding)
    padded:  params pre-padded to 128-lane slabs via pad_and_cast_params()
    out_dim: true (unpadded) output dimension of the head block
    tile_b:  batch rows per grid step (2048 default; 4096 is reasonable on v7x)
    """
    B, in_dim = x.shape
    assert padded["w1"].shape[0] == in_dim, "w1 K dim must match x feature width"
    pout = padded["w3"].shape[1]

    tb, padded_b = _choose_tiling(B, tile_b)
    # Only minimal batch padding (<= 15 rows per grid step); no feature padding,
    # no dtype-cast pass over x.
    xp = x if padded_b == B else jnp.pad(x, ((0, padded_b - B), (0, 0)))
    grid = (padded_b // tb,)

    out_padded = pl.pallas_call(
        nn_stack_kernel,
        out_shape=jax.ShapeDtypeStruct((padded_b, pout), compute_dtype),
        grid=grid,
        in_specs=[
            # batch-tiled input at real feature width (last dim == full array dim),
            # software-pipelined across grid steps
            pl.BlockSpec((tb, in_dim), lambda i: (i, 0)),
            # weights/biases: constant block index -> DMA'd once, VMEM-resident
            pl.BlockSpec(padded["w1"].shape, lambda i: (0, 0)),
            pl.BlockSpec(padded["b1"].shape, lambda i: (0, 0)),
            pl.BlockSpec(padded["w2"].shape, lambda i: (0, 0)),
            pl.BlockSpec(padded["b2"].shape, lambda i: (0, 0)),
            pl.BlockSpec(padded["w3"].shape, lambda i: (0, 0)),
            pl.BlockSpec(padded["b3"].shape, lambda i: (0, 0)),
        ],
        out_specs=pl.BlockSpec((tb, pout), lambda i: (i, 0)),
        compiler_params=pltpu.CompilerParams(
            # Batch axis is embarrassingly parallel (megacore-shardable on v7x).
            # TODO(synk): pltpu.CORE_PARALLEL / explicit core_map for guaranteed
            # per-core splitting on v7x once batch >> tile.
            dimension_semantics=(pltpu.PARALLEL,),
        ),
    )(
        xp,
        padded["w1"], padded["b1"],
        padded["w2"], padded["b2"],
        padded["w3"], padded["b3"],
    )
    # Strip batch padding + the 128-lane head padding; upcast the bf16 store.
    return out_padded[:B, :out_dim].astype(jnp.float32)


def init_params(key, input_dim=16, hidden1=32, hidden2=32, output_dim=8):
    """Deterministic synthetic parameter init (f32, unpadded logical shapes)."""
    k1, k2, k3 = jax.random.split(key, 3)

    def linear(k, fan_in, fan_out):
        scale = 1.0 / jnp.sqrt(jnp.float32(fan_in))
        w = jax.random.uniform(k, (fan_in, fan_out), jnp.float32, -scale, scale)
        b = jnp.zeros((1, fan_out), jnp.float32)
        return w, b

    w1, b1 = linear(k1, input_dim, hidden1)
    w2, b2 = linear(k2, hidden1, hidden2)
    w3, b3 = linear(k3, hidden2, output_dim)
    return {"w1": w1, "b1": b1, "w2": w2, "b2": b2, "w3": w3, "b3": b3}


def pad_and_cast_params(params, compute_dtype=jnp.bfloat16):
    """One-time host-side padding of the parameters.

    Weight *output* dims (and inner hidden K dims) are padded to 128 lanes in
    the compute dtype; w1 keeps its real K rows so x needs no feature padding.
    Biases stay f32 (bias add / ReLU run in f32 on the VPU).  Zero padding is
    exact: padded hidden columns stay exactly zero through the whole stack.
    """
    def pad_to(a, rows, cols, dtype):
        a = a.astype(dtype)
        return jnp.pad(a, ((0, rows - a.shape[0]), (0, cols - a.shape[1])))

    in_dim, h1 = params["w1"].shape
    _, h2 = params["w2"].shape
    _, out_dim = params["w3"].shape
    ph1, ph2, pout = (_round_up(d, LANE) for d in (h1, h2, out_dim))

    return {
        "w1": pad_to(params["w1"], in_dim, ph1, compute_dtype),  # K unpadded
        "b1": pad_to(params["b1"], 1, ph1, jnp.float32),
        "w2": pad_to(params["w2"], ph1, ph2, compute_dtype),
        "b2": pad_to(params["b2"], 1, ph2, jnp.float32),
        "w3": pad_to(params["w3"], ph2, pout, compute_dtype),
        "b3": pad_to(params["b3"], 1, pout, jnp.float32),
    }


def reference_forward_matched(x, p, compute_dtype=jnp.bfloat16):
    """Pure-JAX reference matching the kernel recipe exactly
    (bf16 operands, f32 accumulation, f32 bias/ReLU, bf16 output store)."""
    cd = compute_dtype
    h = jnp.dot(x.astype(cd), p["w1"].astype(cd),
                preferred_element_type=jnp.float32) + p["b1"]
    h = jnp.maximum(h, 0.0)
    h = jnp.dot(h.astype(cd), p["w2"].astype(cd),
                preferred_element_type=jnp.float32) + p["b2"]
    h = jnp.maximum(h, 0.0)
    h = jnp.dot(h.astype(cd), p["w3"].astype(cd),
                preferred_element_type=jnp.float32) + p["b3"]
    return h.astype(cd).astype(jnp.float32)   # mirror the kernel's bf16 output store


def reference_forward_f32(x, p):
    h = jnp.maximum(x @ p["w1"] + p["b1"], 0.0)
    h = jnp.maximum(h @ p["w2"] + p["b2"], 0.0)
    return h @ p["w3"] + p["b3"]


if __name__ == "__main__":
    key = jax.random.PRNGKey(0)
    kx, kp = jax.random.split(key)

    batch, input_dim, hidden1, hidden2, output_dim = 8, 16, 32, 32, 8
    x = jax.random.normal(kx, (batch, input_dim), jnp.float32)
    params = init_params(kp, input_dim=input_dim, hidden1=hidden1,
                         hidden2=hidden2, output_dim=output_dim)
    padded = pad_and_cast_params(params, compute_dtype=jnp.bfloat16)

    out = nn_stack_forward(x, padded, output_dim)
    out = jax.block_until_ready(out)
    assert out.shape == (batch, output_dim)

    # Exact-recipe reference (bf16 operands, f32 accumulation, bf16 output).
    ref = reference_forward_matched(x, params, jnp.bfloat16)
    assert jnp.allclose(out, ref, atol=1e-3, rtol=1e-3), "mismatch vs bf16 reference"

    # Loose sanity check against the original full-f32 module semantics.
    ref_f32 = reference_forward_f32(x, params)
    assert jnp.allclose(out, ref_f32, atol=1e-1, rtol=1e-1), "mismatch vs f32 reference"

    # Second case: non-tile-multiple batch -> exercises the multi-step grid and
    # the minimal (sublane-quantum) batch-padding path.
    x2 = jax.random.normal(kx, (40, input_dim), jnp.float32)
    out2 = jax.block_until_ready(nn_stack_forward(x2, padded, output_dim))
    ref2 = reference_forward_matched(x2, params, jnp.bfloat16)
    assert out2.shape == (40, output_dim)
    assert jnp.allclose(out2, ref2, atol=1e-3, rtol=1e-3), "mismatch on multi-tile batch"

    print("KERNEL_OK")
</pallas_src>

<mosaic_0001>
module attributes {stable_mosaic.version = 11 : i64} {
  func.func @nn_stack_kernel(%arg0: i32, %arg1: memref<16x16xf32, #tpu.memory_space<vmem>>, %arg2: memref<16x128xbf16, #tpu.memory_space<vmem>>, %arg3: memref<1x128xf32, #tpu.memory_space<vmem>>, %arg4: memref<128x128xbf16, #tpu.memory_space<vmem>>, %arg5: memref<1x128xf32, #tpu.memory_space<vmem>>, %arg6: memref<128x128xbf16, #tpu.memory_space<vmem>>, %arg7: memref<1x128xf32, #tpu.memory_space<vmem>>, %arg8: memref<16x128xbf16, #tpu.memory_space<vmem>>) attributes {dimension_semantics = [#tpu.dimension_semantics<parallel>], iteration_bounds = array<i64: 1>, scalar_prefetch = 0 : i64, scratch_operands = 0 : i64, tpu.core_type = #tpu.core_type<tc>, window_params = [{transform_indices = @transform_0, window_bounds = array<i64: 16, 16>}, {pipeline_mode = #tpu.pipeline_mode<synchronous>, transform_indices = @transform_1, window_bounds = array<i64: 16, 128>}, {pipeline_mode = #tpu.pipeline_mode<synchronous>, transform_indices = @transform_2, window_bounds = array<i64: 1, 128>}, {pipeline_mode = #tpu.pipeline_mode<synchronous>, transform_indices = @transform_3, window_bounds = array<i64: 128, 128>}, {pipeline_mode = #tpu.pipeline_mode<synchronous>, transform_indices = @transform_4, window_bounds = array<i64: 1, 128>}, {pipeline_mode = #tpu.pipeline_mode<synchronous>, transform_indices = @transform_5, window_bounds = array<i64: 128, 128>}, {pipeline_mode = #tpu.pipeline_mode<synchronous>, transform_indices = @transform_6, window_bounds = array<i64: 1, 128>}, {transform_indices = @transform_7, window_bounds = array<i64: 16, 128>}]} {
    %c0 = arith.constant 0 : index
    %c0_0 = arith.constant 0 : index
    %0 = vector.load %arg1[%c0, %c0_0] : memref<16x16xf32, #tpu.memory_space<vmem>>, vector<16x16xf32>
    %1 = arith.truncf %0 : vector<16x16xf32> to vector<16x16xbf16>
    %c0_1 = arith.constant 0 : index
    %c0_2 = arith.constant 0 : index
    %2 = vector.load %arg2[%c0_1, %c0_2] : memref<16x128xbf16, #tpu.memory_space<vmem>>, vector<16x128xbf16>
    %cst = arith.constant dense<0.000000e+00> : vector<16x128xf32>
    %3 = tpu.matmul %1, %2, %cst {dimension_numbers = #tpu.dot_dimension_numbers<[1], [0], [0], [1], [0, 0, 1, 1], [], []>} : vector<16x16xbf16>, vector<16x128xbf16>, vector<16x128xf32> -> vector<16x128xf32>
    %c0_3 = arith.constant 0 : index
    %c0_4 = arith.constant 0 : index
    %4 = vector.load %arg3[%c0_3, %c0_4] : memref<1x128xf32, #tpu.memory_space<vmem>>, vector<1x128xf32>
    %5 = vector.broadcast %4 : vector<1x128xf32> to vector<16x128xf32>
    %6 = arith.addf %3, %5 : vector<16x128xf32>
    %cst_5 = arith.constant 0.000000e+00 : f32
    %7 = vector.broadcast %cst_5 : f32 to vector<16x128xf32>
    %8 = arith.maximumf %6, %7 : vector<16x128xf32>
    %9 = arith.truncf %8 : vector<16x128xf32> to vector<16x128xbf16>
    %c0_6 = arith.constant 0 : index
    %c0_7 = arith.constant 0 : index
    %10 = vector.load %arg4[%c0_6, %c0_7] : memref<128x128xbf16, #tpu.memory_space<vmem>>, vector<128x128xbf16>
    %cst_8 = arith.constant dense<0.000000e+00> : vector<16x128xf32>
    %11 = tpu.matmul %9, %10, %cst_8 {dimension_numbers = #tpu.dot_dimension_numbers<[1], [0], [0], [1], [0, 0, 1, 1], [], []>} : vector<16x128xbf16>, vector<128x128xbf16>, vector<16x128xf32> -> vector<16x128xf32>
    %c0_9 = arith.constant 0 : index
    %c0_10 = arith.constant 0 : index
    %12 = vector.load %arg5[%c0_9, %c0_10] : memref<1x128xf32, #tpu.memory_space<vmem>>, vector<1x128xf32>
    %13 = vector.broadcast %12 : vector<1x128xf32> to vector<16x128xf32>
    %14 = arith.addf %11, %13 : vector<16x128xf32>
    %cst_11 = arith.constant 0.000000e+00 : f32
    %15 = vector.broadcast %cst_11 : f32 to vector<16x128xf32>
    %16 = arith.maximumf %14, %15 : vector<16x128xf32>
    %17 = arith.truncf %16 : vector<16x128xf32> to vector<16x128xbf16>
    %c0_12 = arith.constant 0 : index
    %c0_13 = arith.constant 0 : index
    %18 = vector.load %arg6[%c0_12, %c0_13] : memref<128x128xbf16, #tpu.memory_space<vmem>>, vector<128x128xbf16>
    %cst_14 = arith.constant dense<0.000000e+00> : vector<16x128xf32>
    %19 = tpu.matmul %17, %18, %cst_14 {dimension_numbers = #tpu.dot_dimension_numbers<[1], [0], [0], [1], [0, 0, 1, 1], [], []>} : vector<16x128xbf16>, vector<128x128xbf16>, vector<16x128xf32> -> vector<16x128xf32>
    %c0_15 = arith.constant 0 : index
    %c0_16 = arith.constant 0 : index
    %20 = vector.load %arg7[%c0_15, %c0_16] : memref<1x128xf32, #tpu.memory_space<vmem>>, vector<1x128xf32>
    %21 = vector.broadcast %20 : vector<1x128xf32> to vector<16x128xf32>
    %22 = arith.addf %19, %21 : vector<16x128xf32>
    %23 = arith.truncf %22 : vector<16x128xf32> to vector<16x128xbf16>
    %c0_17 = arith.constant 0 : index
    %c0_18 = arith.constant 0 : index
    %24 = vector.load %arg8[%c0_17, %c0_18] : memref<16x128xbf16, #tpu.memory_space<vmem>>, vector<16x128xbf16>
    tpu.vector_store %arg8[%c0_17, %c0_18], %23 {strides = array<i32>} : memref<16x128xbf16, #tpu.memory_space<vmem>>, vector<16x128xbf16>,
    return
  }
  func.func @transform_0(%arg0: i32) -> (i32, i32) {
    %c0_i32 = arith.constant 0 : i32
    %c0_i32_0 = arith.constant 0 : i32
    return %arg0, %c0_i32 : i32, i32
  }
  func.func @transform_1(%arg0: i32) -> (i32, i32) {
    %c0_i32 = arith.constant 0 : i32
    %c0_i32_0 = arith.constant 0 : i32
    %c0_i32_1 = arith.constant 0 : i32
    return %c0_i32, %c0_i32_0 : i32, i32
  }
  func.func @transform_2(%arg0: i32) -> (i32, i32) {
    %c0_i32 = arith.constant 0 : i32
    %c0_i32_0 = arith.constant 0 : i32
    %c0_i32_1 = arith.constant 0 : i32
    return %c0_i32, %c0_i32_0 : i32, i32
  }
  func.func @transform_3(%arg0: i32) -> (i32, i32) {
    %c0_i32 = arith.constant 0 : i32
    %c0_i32_0 = arith.constant 0 : i32
    %c0_i32_1 = arith.constant 0 : i32
    return %c0_i32, %c0_i32_0 : i32, i32
  }
  func.func @transform_4(%arg0: i32) -> (i32, i32) {
    %c0_i32 = arith.constant 0 : i32
    %c0_i32_0 = arith.constant 0 : i32
    %c0_i32_1 = arith.constant 0 : i32
    return %c0_i32, %c0_i32_0 : i32, i32
  }
  func.func @transform_5(%arg0: i32) -> (i32, i32) {
    %c0_i32 = arith.constant 0 : i32
    %c0_i32_0 = arith.constant 0 : i32
    %c0_i32_1 = arith.constant 0 : i32
    return %c0_i32, %c0_i32_0 : i32, i32
  }
  func.func @transform_6(%arg0: i32) -> (i32, i32) {
    %c0_i32 = arith.constant 0 : i32
    %c0_i32_0 = arith.constant 0 : i32
    %c0_i32_1 = arith.constant 0 : i32
    return %c0_i32, %c0_i32_0 : i32, i32
  }
  func.func @transform_7(%arg0: i32) -> (i32, i32) {
    %c0_i32 = arith.constant 0 : i32
    %c0_i32_0 = arith.constant 0 : i32
    return %arg0, %c0_i32 : i32, i32
  }
}

</mosaic_0001>

<bundles_post_ra>
// kernel: tpu_custom_call.1
= control target key start
LH: loop header
LB: loop body
LE: loop exit
PB: predicated region body
PF: predicated region fallthrough
CT: control target
= control target key end

     0   :  { %12 = vsyncpa [#allocation3], 0  ;;  %s809_s0 = inlined_call_operand.hbm [shape: f32[16,16], index: 0, kind: input, shape index: {}]   ;;  %s810_s1 = inlined_call_operand.hbm [shape: bf16[16,128], index: 1, kind: input, shape index: {}]   ;;  %s811_s2 = inlined_call_operand.vmem [shape: f32[1,128], index: 2, kind: input, shape index: {}]   ;;  %s812_s3 = inlined_call_operand.hbm [shape: bf16[128,128], index: 3, kind: input, shape index: {}]   ;;  %s813_s4 = inlined_call_operand.vmem [shape: f32[1,128], index: 4, kind: input, shape index: {}]   ;;  %s814_s5 = inlined_call_operand.hbm [shape: bf16[128,128], index: 5, kind: input, shape index: {}]   ;;  %s815_s6 = inlined_call_operand.vmem [shape: f32[1,128], index: 6, kind: input, shape index: {}]   ;;  %s816_s7 = inlined_call_operand.hbm [shape: bf16[16,128], index: 7, kind: output, shape index: {}]  }
   0x1   :  { %13 = vsyncpa [#allocation6], 0 }
   0x2   :  { %14 = vsyncpa [#allocation9], 0 }
   0x3   :  { %15 = vsyncpa [#allocation4], 0  ;;  %s647_s24 = smov [#allocation5]   ;;  %s529_s28 = scalar_lea.hbm %s810_s1, 128 }
   0x4   :  { %s33_s25 = sshll.u32 %s647_s24, 4  ;;  %p530_p0 = scmp.ne.s32.totalorder %s810_s1, %s529_s28  ;;  %s34_s25 = int_to_ptr.vmem [resolvable:$true] %s33_s25 }
   0x5   :  { %p533_p1 = scmp.lt.u32.totalorder %s529_s28, %s810_s1 }
   0x7   :  { %p535_p2 = pnand %p533_p1, %p530_p0 }
   0x9   :  { %538 = shalt.err (!%p535_p2)
}
   0xa   :  { %s539_s10 = scalar_lea.vmem %s34_s25, 128  ;;  %p544_p4 = scmp.lt.s32.totalorder %s34_s25, %s34_s25 }
   0xb   :  { %p540_p3 = scmp.ne.s32.totalorder %s34_s25, %s539_s10  ;;  %p545_p5 = scmp.lt.s32.totalorder %s539_s10, %s539_s10 }
   0xd   :  { %p546_p6 = por %p545_p5, %p544_p4 }
   0xf   :  { %p547_p7 = pnand %p546_p6, %p540_p3 }
  0x11   :  { %550 = shalt.err (!%p547_p7)
}
  0x12   :  { %s648_s11 = smov 64   ;;  %s649_s12 = smov 4  }
  0x13   :  { %39 = dma.hbm_to_vmem [thread:$0]  %s810_s1, 128, %s34_s25, [#allocation6], %s648_s11, %s648_s11, %s649_s12  }
  0x14   :  { %s650_s15 = smov [#allocation2]   ;;  %s551_s19 = scalar_lea.hbm %s809_s0, 256 }
  0x15   :  { %s21_s16 = sshll.u32 %s650_s15, 4  ;;  %p552_p8 = scmp.ne.s32.totalorder %s809_s0, %s551_s19  ;;  %s22_s16 = int_to_ptr.vmem [resolvable:$true] %s21_s16 }
  0x16   :  { %p555_p9 = scmp.lt.u32.totalorder %s551_s19, %s809_s0 }
  0x18   :  { %p557_p10 = pnand %p555_p9, %p552_p8 }
  0x1a   :  { %560 = shalt.err (!%p557_p10)
}
  0x1b   :  { %s561_s24 = scalar_lea.vmem %s22_s16, 256  ;;  %p566_p12 = scmp.lt.s32.totalorder %s22_s16, %s22_s16 }
  0x1c   :  { %p562_p11 = scmp.ne.s32.totalorder %s22_s16, %s561_s24  ;;  %p567_p13 = scmp.lt.s32.totalorder %s561_s24, %s561_s24 }
  0x1e   :  { %p568_p0 = por %p567_p13, %p566_p12 }
  0x20   :  { %p569_p1 = pnand %p568_p0, %p562_p11 }
  0x22   :  { %572 = shalt.err (!%p569_p1)
}
  0x23   :  { %s651_s1 = smov 128   ;;  %s652_s25 = smov 8  }
  0x24   :  { %27 = dma.hbm_to_vmem [thread:$0]  %s809_s0, 256, %s22_s16, [#allocation3], %s651_s1, %s651_s1, %s652_s25  }
  0x25   :  { %s653_s28 = smov [#allocation7]   ;;  %s654_s30 = smov [#allocation8]  }
  0x26   :  { %s47_s29 = sshll.u32 %s653_s28, 4  ;;  %s61_s8 = sshll.u32 %s654_s30, 4  ;;  %s48_s29 = int_to_ptr.vmem [resolvable:$true] %s47_s29  ;;  %s725_s8 = int_to_ptr.vmem [resolvable:$true] %s61_s8 }
  0x27   :  { %s573_s13 = scalar_lea.hbm %s812_s3, 1024 }
  0x28   :  { %p574_p2 = scmp.ne.s32.totalorder %s812_s3, %s573_s13  ;;  %p577_p3 = scmp.lt.u32.totalorder %s573_s13, %s812_s3 }
  0x2a   :  { %p579_p4 = pnand %p577_p3, %p574_p2 }
  0x2c   :  { %582 = shalt.err (!%p579_p4)
}
  0x2d   :  { %s583_s0 = scalar_lea.vmem %s48_s29, 1024  ;;  %p588_p6 = scmp.lt.s32.totalorder %s48_s29, %s48_s29 }
  0x2e   :  { %p584_p5 = scmp.ne.s32.totalorder %s48_s29, %s583_s0  ;;  %p589_p7 = scmp.lt.s32.totalorder %s583_s0, %s583_s0 }
  0x30   :  { %p590_p8 = por %p589_p7, %p588_p6 }
  0x32   :  { %p591_p9 = pnand %p590_p8, %p584_p5 }
  0x34   :  { %594 = shalt.err (!%p591_p9)
}
  0x35   :  { %53 = dma.hbm_to_vmem [thread:$0]  %s812_s3, 1024, %s48_s29, [#allocation6], %s648_s11, %s648_s11, %s649_s12  }
  0x36   :  { %s595_s22 = scalar_lea.hbm %s814_s5, 1024 }
  0x37   :  { %p596_p10 = scmp.ne.s32.totalorder %s814_s5, %s595_s22  ;;  %p599_p11 = scmp.lt.u32.totalorder %s595_s22, %s814_s5 }
  0x39   :  { %p601_p12 = pnand %p599_p11, %p596_p10 }
  0x3b   :  { %604 = shalt.err (!%p601_p12)
}
  0x3c   :  { %s605_s26 = scalar_lea.vmem %s725_s8, 1024  ;;  %p610_p0 = scmp.lt.s32.totalorder %s725_s8, %s725_s8 }
  0x3d   :  { %p606_p13 = scmp.ne.s32.totalorder %s725_s8, %s605_s26  ;;  %p611_p1 = scmp.lt.s32.totalorder %s605_s26, %s605_s26 }
  0x3f   :  { %p612_p2 = por %p611_p1, %p610_p0 }
  0x41   :  { %p613_p3 = pnand %p612_p2, %p606_p13 }
  0x43   :  { %616 = shalt.err (!%p613_p3)
}
  0x44   :  { %67 = dma.hbm_to_vmem [thread:$0]  %s814_s5, 1024, %s725_s8, [#allocation9], %s648_s11, %s648_s11, %s649_s12  }
  0x45   :  { %639 = dma.done.wait [#allocation3], 256  }
  0x46   :  { %640 = vsyncadd [#allocation3], 4294967040 }
  0x47   :  { %641 = dma.done.wait [#allocation6], 1152  }
  0x48   :  { %642 = vsyncadd [#allocation6], 4294966144 }
  0x49   :  { %643 = dma.done.wait [#allocation9], 1024  }
  0x4a   :  { %644 = vsyncadd [#allocation9], 4294966272  ;;  %v655_v0 = vmov 0.0   ;;  %vm656_vm0 = vmmov 0   ;;  %v512_v1 = vld [vmem:[#allocation5] sm:$0xff]   ;;  %v83_v2 = vld [vmem:[#allocation2] sm:$0xff] }
  0x4b   :  { %455 = vmatprep.subr.bf16.mxu0 %v655_v0  ;;  %457 = vmatprep.mubr.msk.bf16.mxu0 %vm656_vm0, %v655_v0  ;;  %v84_v3 = vld [vmem:[#allocation2 + $0x8] sm:$0xff]  ;;  %vm101_vm1 = vcmask 130048   ;;  %v513_v5 = vld [vmem:[#allocation7] sm:$0xff]   ;;  %v514_v6 = vld [vmem:[#allocation7 + $0x8] sm:$0xff]   ;;  %s657_s9 = smov [#allocation10]  }
  0x4c   :  { %461 = vmatprep.subr.bf16.mxu1 %v655_v0  ;;  %477 = vmatprep.mubr.msk.bf16.mxu1 %vm656_vm0, %v655_v0  ;;  %v85_v4 = vpack.c.bf16 %v84_v3, %v83_v2  ;;  %v515_v7 = vld [vmem:[#allocation7 + $0x10] sm:$0xff]   ;;  %v516_v8 = vld [vmem:[#allocation7 + $0x18] sm:$0xff]   ;;  %v517_v9 = vld [vmem:[#allocation7 + $0x20] sm:$0xff]   ;;  %s391_s10 = sshll.u32 %s657_s9, 4  ;;  %s392_s10 = int_to_ptr.vmem [resolvable:$true] %s391_s10 }
  0x4d   :  { %456 = vmatpush3.bf16.msra.mxu0 %v512_v1  ;;  %462 = vmatpush3.bf16.msra.mxu1 %v513_v5  ;;  %v518_v10 = vld [vmem:[#allocation7 + $0x28] sm:$0xff]   ;;  %v519_v11 = vld [vmem:[#allocation7 + $0x30] sm:$0xff]   ;;  %v520_v12 = vld [vmem:[#allocation7 + $0x38] sm:$0xff]   ;;  %p622_p5 = scmp.lt.s32.totalorder %s392_s10, %s392_s10 }
  0x4e   :  { %481 = vmatprep.subr.bf16.mxu0 %v655_v0  ;;  %463 = vmatprep.subr.bf16.mxu1 %v655_v0  ;;  %v521_v13 = vld [vmem:[#allocation8] sm:$0xff]   ;;  %v522_v14 = vld [vmem:[#allocation8 + $0x8] sm:$0xff]   ;;  %v523_v15 = vld [vmem:[#allocation8 + $0x10] sm:$0xff]  }
  0x4f   :  { %v524_v16 = vld [vmem:[#allocation8 + $0x18] sm:$0xff]   ;;  %v525_v17 = vld [vmem:[#allocation8 + $0x20] sm:$0xff]   ;;  %v526_v18 = vld [vmem:[#allocation8 + $0x28] sm:$0xff]  }
  0x50   :  { %458 = vmatmul.mubr.msk.bf16.vlgmr.msra.gmra.mrb[0].mxu0 %vm101_vm1, %v85_v4  ;;  %v405_v19 = vld [vmem:[%s811_s2] ss:$0 sm:$0xff]  ;;  %v527_v29 = vld [vmem:[#allocation8 + $0x30] sm:$0xff]   ;;  %v528_v30 = vld [vmem:[#allocation8 + $0x38] sm:$0xff]  }
  0x51   :  { %497 = vmatprep.mubr.msk.bf16.mxu0 %vm656_vm0, %v655_v0  ;;  %464 = vmatpush3.bf16.msra.mxu1 %v514_v6  ;;  %v408_v31 = vld [vmem:[%s813_s4] ss:$0 sm:$0xff]  ;;  %s617_s4 = scalar_lea.vmem %s392_s10, 128 }
  0x52   :  { %465 = vmatprep.subr.bf16.mxu1 %v655_v0  ;;  %482 = vmatpush3.bf16.msra.mxu0 %v521_v13  ;;  %v417_v41 = vld [vmem:[%s815_s6] ss:$0 sm:$0xff]  ;;  %p618_p4 = scmp.ne.s32.totalorder %s392_s10, %s617_s4  ;;  %p623_p6 = scmp.lt.s32.totalorder %s617_s4, %s617_s4 }
  0x53   :  { %483 = vmatprep.subr.bf16.mxu0 %v655_v0 }
  0x54   :  { %p624_p7 = por %p623_p6, %p622_p5 }
  0x55   :  { %466 = vmatpush3.bf16.msra.mxu1 %v515_v7 }
  0x56   :  { %467 = vmatprep.subr.bf16.mxu1 %v655_v0  ;;  %484 = vmatpush3.bf16.msra.mxu0 %v522_v14  ;;  %p625_p8 = pnand %p624_p7, %p618_p4 }
  0x57   :  { %485 = vmatprep.subr.bf16.mxu0 %v655_v0 }
  0x59   :  { %468 = vmatpush3.bf16.msra.mxu1 %v516_v8 }
  0x5a   :  { %469 = vmatprep.subr.bf16.mxu1 %v655_v0  ;;  %486 = vmatpush3.bf16.msra.mxu0 %v523_v15 }
  0x5b   :  { %487 = vmatprep.subr.bf16.mxu0 %v655_v0 }
  0x5d   :  { %470 = vmatpush3.bf16.msra.mxu1 %v517_v9 }
  0x5e   :  { %471 = vmatprep.subr.bf16.mxu1 %v655_v0  ;;  %488 = vmatpush3.bf16.msra.mxu0 %v524_v16 }
  0x5f   :  { %489 = vmatprep.subr.bf16.mxu0 %v655_v0 }
  0x61   :  { %472 = vmatpush3.bf16.msra.mxu1 %v518_v10 }
  0x62   :  { %473 = vmatprep.subr.bf16.mxu1 %v655_v0  ;;  %490 = vmatpush3.bf16.msra.mxu0 %v525_v17 }
  0x63   :  { %491 = vmatprep.subr.bf16.mxu0 %v655_v0 }
  0x65   :  { %474 = vmatpush3.bf16.msra.mxu1 %v519_v11 }
  0x66   :  { %475 = vmatprep.subr.bf16.mxu1 %v655_v0  ;;  %492 = vmatpush3.bf16.msra.mxu0 %v526_v18 }
  0x67   :  { %493 = vmatprep.subr.bf16.mxu0 %v655_v0 }
  0x69   :  { %476 = vmatpush3.bf16.msra.mxu1 %v520_v12 }
  0x6a   :  { %494 = vmatpush3.bf16.msra.mxu0 %v527_v29 }
  0x6b   :  { %495 = vmatprep.subr.bf16.mxu0 %v655_v0 }
  0x6e   :  { %496 = vmatpush3.bf16.msra.mxu0 %v528_v30 }
 0x123   :  { %v139_v20 = vpop.f32.mrb[0].mxu0 }
 0x124   :  { %v140_v21 = vadd.f32 %v405_v19, %v139_v20  ;;  %v459_v22 = vpop.f32.mrb[1].mxu0 }
 0x125   :  { %v142_v23 = vpop.f32.mrb[2].mxu0 }
 0x126   :  { %v143_v24 = vadd.f32 %v405_v19, %v142_v23  ;;  %v460_v25 = vpop.f32.mrb[3].mxu0  ;;  %v146_v26 = vmax.f32 %v140_v21, 0.0 }
 0x128   :  { %v147_v27 = vmax.f32 %v143_v24, 0.0 }
 0x12a   :  { %v148_v28 = vpack.c.bf16 %v147_v27, %v146_v26 }
 0x12c   :  { %478 = vmatmul.mubr.bf16.vlgmr.msra.gmra.mrb[0].mxu1 %v148_v28 }
 0x1ff   :  { %v254_v32 = vpop.f32.mrb[0].mxu1 }
 0x200   :  { %v255_v33 = vadd.f32 %v408_v31, %v254_v32  ;;  %v479_v34 = vpop.f32.mrb[1].mxu1 }
 0x201   :  { %v257_v35 = vpop.f32.mrb[2].mxu1 }
 0x202   :  { %v258_v36 = vadd.f32 %v408_v31, %v257_v35  ;;  %v480_v37 = vpop.f32.mrb[3].mxu1  ;;  %v261_v38 = vmax.f32 %v255_v33, 0.0 }
 0x204   :  { %v262_v39 = vmax.f32 %v258_v36, 0.0 }
 0x206   :  { %v263_v40 = vpack.c.bf16 %v262_v39, %v261_v38 }
 0x208   :  { %498 = vmatmul.mubr.bf16.vlgmr.msra.gmra.mrb[4].mxu0 %v263_v40 }
 0x2db   :  { %v369_v42 = vpop.f32.mrb[4].mxu0 }
 0x2dc   :  { %v499_v43 = vpop.f32.mrb[5].mxu0  ;;  %v370_v45 = vadd.f32 %v417_v41, %v369_v42 }
 0x2dd   :  { %v372_v44 = vpop.f32.mrb[6].mxu0 }
 0x2de   :  { %v373_v46 = vadd.f32 %v417_v41, %v372_v44  ;;  %v500_v47 = vpop.f32.mrb[7].mxu0 }
 0x2e0   :  { %v433_v48 = vpack.c.bf16 %v373_v46, %v370_v45 }
 0x2e2   :  { %434 = vst [vmem:[#allocation10] sm:$0xff] %v433_v48  }
 0x2e3   :  { %628 = shalt.err (!%p625_p8)
}
 0x2e4   :  { %s629_s14 = scalar_lea.hbm %s816_s7, 128 }
 0x2e5   :  { %p630_p9 = scmp.ne.s32.totalorder %s816_s7, %s629_s14  ;;  %p633_p10 = scmp.lt.u32.totalorder %s629_s14, %s816_s7 }
 0x2e7   :  { %p635_p11 = pnand %p633_p10, %p630_p9 }
 0x2e9   :  { %638 = shalt.err (!%p635_p11)
}
 0x2ea   :  { %397 = dma.vmem_to_hbm [thread:$0]  %s392_s10, 128, %s816_s7, [#allocation4], %s648_s11, %s648_s11, %s649_s12  }
 0x2eb   :  { %645 = dma.done.wait [#allocation4], 128  }
 0x2ec   :  { %646 = vsyncadd [#allocation4], 4294967168 }
 0x2ed   :  { %401 = vsyncpa [#allocation3], 1 }
 0x2ee   :  { %402 = vsyncpa [#allocation6], 1 }
 0x2ef   :  { %403 = vsyncpa [#allocation9], 1 }
 0x2f0   :  { %404 = vsyncpa [#allocation4], 1 }

</bundles_post_ra>
